<compile_context>
chip_gen: v7x
topology: tpu7x:2x2x1
jax: 0.10.0
libtpu: 0.0.40
codegen_flags: <defaults>
</compile_context>

<pallas_src>
import functools

import jax
import jax.numpy as jnp
from jax.experimental import pallas as pl
from jax.experimental.pallas import tpu as pltpu

_HIDDEN = 64
_N_OUT = 2
_N_OUT_PAD = 8        # small padded output width (full-dim block => legal)
_SUBLANE = 8          # f32 sublane quantum


def _round_up(x, m):
    return -(-x // m) * m


def _twinnet_kernel(force_ref, w1_ref, b1_ref, w2_ref, b2_ref, w3_ref, b3_ref,
                    out_ref):
    # In-kernel operand cast (f32 -> compute dtype of the weights); avoids a
    # separate wrapper-side cast pass over the force array.
    x = force_ref[...].astype(w1_ref.dtype)                      # [tB, F]

    # linear1 + ReLU  (MXU dot, f32 accumulation; bias/ReLU on VPU in f32)
    h1 = jnp.dot(x, w1_ref[...], preferred_element_type=jnp.float32)
    h1 = jnp.maximum(h1 + b1_ref[...], 0.0)                      # [tB, 64] f32

    # linear2 + ReLU
    h2 = jnp.dot(h1.astype(w2_ref.dtype), w2_ref[...],
                 preferred_element_type=jnp.float32)
    h2 = jnp.maximum(h2 + b2_ref[...], 0.0)                      # [tB, 64] f32

    # linear3 (padded to 8 output columns; columns 2..7 are zero weights)
    out = jnp.dot(h2.astype(w3_ref.dtype), w3_ref[...],
                  preferred_element_type=jnp.float32)
    out_ref[...] = (out + b3_ref[...]).astype(out_ref.dtype)     # [tB, 8] f32


def _twinnet_pallas(force, w1, b1, w2, b2, w3p, b3p, *, tile_b):
    """force: [B_pad, F] (B_pad % tile_b == 0). Returns [B_pad, 8] f32."""
    batch_pad, force_dim = force.shape
    n_tiles = batch_pad // tile_b
    in_itemsize = jnp.dtype(force.dtype).itemsize
    w_itemsize = jnp.dtype(w1.dtype).itemsize

    # Scoped-VMEM budget from the actual (double-buffered) tiles; clamp well
    # below v7x's 64 MiB physical VMEM to leave Mosaic scratch headroom.
    in_tile_bytes = tile_b * force_dim * in_itemsize
    out_tile_bytes = tile_b * _N_OUT_PAD * 4
    weight_bytes = ((force_dim * _HIDDEN + _HIDDEN * _HIDDEN
                     + _HIDDEN * _N_OUT_PAD) * w_itemsize
                    + (_HIDDEN + _HIDDEN + _N_OUT_PAD) * 4)
    vmem_bytes = 2 * (in_tile_bytes + out_tile_bytes + weight_bytes) + (8 << 20)
    vmem_bytes = max(16 << 20, min(vmem_bytes, 48 << 20))

    resident = lambda shape: pl.BlockSpec(shape, lambda i: (0, 0))

    return pl.pallas_call(
        _twinnet_kernel,
        out_shape=jax.ShapeDtypeStruct((batch_pad, _N_OUT_PAD), jnp.float32),
        grid=(n_tiles,),
        in_specs=[
            pl.BlockSpec((tile_b, force_dim), lambda i: (i, 0)),   # force tile
            resident((force_dim, _HIDDEN)),                        # w1
            resident((1, _HIDDEN)),                                # b1 (f32)
            resident((_HIDDEN, _HIDDEN)),                          # w2
            resident((1, _HIDDEN)),                                # b2 (f32)
            resident((_HIDDEN, _N_OUT_PAD)),                       # w3 (padded)
            resident((1, _N_OUT_PAD)),                             # b3 (padded)
        ],
        out_specs=pl.BlockSpec((tile_b, _N_OUT_PAD), lambda i: (i, 0)),
        compiler_params=pltpu.CompilerParams(
            dimension_semantics=("parallel",),
            vmem_limit_bytes=int(vmem_bytes),
        ),
    )(force, w1, b1, w2, b2, w3p, b3p)


def _choose_tile(batch, tile_b):
    """Batch tile: sublane-aligned, large, but always >= 2 grid steps when the
    batch allows it (keeps both v7x TensorCores busy under 'parallel')."""
    tile = max(_SUBLANE, (tile_b // _SUBLANE) * _SUBLANE)
    if batch > _SUBLANE:
        half = _round_up(-(-batch // 2), _SUBLANE)   # ceil(batch/2), aligned
        tile = min(tile, half)
    else:
        tile = _SUBLANE
    return tile


@functools.partial(jax.jit,
                   static_argnames=("tile_b", "compute_dtype", "use_pallas"))
def twinnet_forward(state, force, params, *, tile_b=4096,
                    compute_dtype=jnp.float32, use_pallas=None):
    """TwinNet forward.  `state` is accepted to mirror the PyTorch signature
    but (as in the reference) is unused.

    compute_dtype: dtype of the MXU operands.  Default f32 (best on v5e).
      jnp.bfloat16 casts the weights outside and the force tile inside the
      kernel (f32 accumulation; bias-add / ReLU stay f32).  Note the input
      precision is reduced too, not just the weights.
    use_pallas: True/False to force a path; None = auto (pure JAX for tiny
      batches where per-call overhead dominates).
    """
    del state  # unused by the reference forward pass
    w1, b1, w2, b2, w3, b3 = params
    batch, force_dim = force.shape

    if use_pallas is None:
        use_pallas = batch >= 1024

    if not use_pallas:
        # Tiny batch: XLA fuses this 3-layer MLP fine; a kernel launch would
        # be pure overhead.
        h = jnp.maximum(force @ w1 + b1, 0.0)
        h = jnp.maximum(h @ w2 + b2, 0.0)
        return h @ w3 + b3

    # ---- Pallas path -------------------------------------------------------
    # Weights in compute_dtype (tiny, cast once, VMEM-resident); biases f32.
    # The force tile is cast inside the kernel (no extra wrapper HBM pass).
    w1_c = w1.astype(compute_dtype)
    w2_c = w2.astype(compute_dtype)
    w3_c = w3.astype(compute_dtype)
    b1_f = b1.astype(jnp.float32)
    b2_f = b2.astype(jnp.float32)
    b3_f = b3.astype(jnp.float32)

    # Pad the last layer to a small 8-wide output block (full-dim block).
    w3p = jnp.pad(w3_c, ((0, 0), (0, _N_OUT_PAD - _N_OUT)))
    b3p = jnp.pad(b3_f, ((0, 0), (0, _N_OUT_PAD - _N_OUT)))

    tile_b_eff = _choose_tile(batch, tile_b)
    pad_rows = (-batch) % tile_b_eff
    force_p = force
    if pad_rows:
        # Padded rows produce bias-only garbage; they are sliced off below and
        # nothing in the kernel reduces over the batch axis.
        force_p = jnp.pad(force, ((0, pad_rows), (0, 0)))

    out_full = _twinnet_pallas(force_p, w1_c, b1_f, w2_c, b2_f, w3p, b3p,
                               tile_b=tile_b_eff)
    return out_full[:batch, :_N_OUT]


def init_params(key, force_dim):
    """Deterministic init mimicking PyTorch nn.Linear default:
    U(-1/sqrt(fan_in), 1/sqrt(fan_in)) for weight and bias.
    Weights stored as [in, out]; biases as [1, out]."""
    def linear(k, fan_in, fan_out):
        kw, kb = jax.random.split(k)
        bound = 1.0 / jnp.sqrt(jnp.float32(fan_in))
        w = jax.random.uniform(kw, (fan_in, fan_out), jnp.float32, -bound, bound)
        b = jax.random.uniform(kb, (1, fan_out), jnp.float32, -bound, bound)
        return w, b

    k1, k2, k3 = jax.random.split(key, 3)
    w1, b1 = linear(k1, force_dim, _HIDDEN)
    w2, b2 = linear(k2, _HIDDEN, _HIDDEN)
    w3, b3 = linear(k3, _HIDDEN, _N_OUT)
    return (w1, b1, w2, b2, w3, b3)


def twinnet_reference(state, force, params):
    """Pure-JAX f32 reference for correctness checking."""
    del state
    w1, b1, w2, b2, w3, b3 = params
    h = jnp.maximum(force @ w1 + b1, 0.0)
    h = jnp.maximum(h @ w2 + b2, 0.0)
    return h @ w3 + b3


if __name__ == "__main__":
    key = jax.random.PRNGKey(0)
    k_params, k_state, k_force = jax.random.split(key, 3)

    batch = 64           # small test shape; Pallas path forced below
    state_dim = 32       # unused by forward, kept for signature parity
    force_dim = 16

    params = init_params(k_params, force_dim)
    state = jax.random.normal(k_state, (batch, state_dim), jnp.float32)
    force = jax.random.normal(k_force, (batch, force_dim), jnp.float32)

    ref = twinnet_reference(state, force, params)

    # 1) Pallas path, f32 operands: exact-ish match to the reference.
    out_f32 = twinnet_forward(state, force, params, use_pallas=True,
                              compute_dtype=jnp.float32)
    out_f32 = jax.block_until_ready(out_f32)
    assert out_f32.shape == (batch, _N_OUT), out_f32.shape
    assert jnp.allclose(out_f32, ref, atol=1e-5, rtol=1e-5), "f32 mismatch"

    # 2) Pallas path, bf16 operands (in-kernel cast), f32 accumulation:
    #    loose tolerance.
    out_bf16 = twinnet_forward(state, force, params, use_pallas=True,
                               compute_dtype=jnp.bfloat16)
    out_bf16 = jax.block_until_ready(out_bf16)
    assert out_bf16.shape == (batch, _N_OUT), out_bf16.shape
    assert jnp.allclose(out_bf16, ref, atol=5e-2, rtol=5e-2), "bf16 mismatch"

    # 3) Odd, non-tile-aligned batch through the Pallas path (padding branch).
    out_odd = twinnet_forward(state[:37], force[:37], params, use_pallas=True,
                              compute_dtype=jnp.float32)
    out_odd = jax.block_until_ready(out_odd)
    assert jnp.allclose(out_odd, ref[:37], atol=1e-5, rtol=1e-5), "odd mismatch"

    # 4) Auto-dispatch: tiny batch takes the pure-JAX path (no kernel launch).
    out_auto = jax.block_until_ready(
        twinnet_forward(state[:8], force[:8], params))
    assert jnp.allclose(out_auto, ref[:8], atol=1e-5, rtol=1e-5), "auto mismatch"

    print("KERNEL_OK")
</pallas_src>

<mosaic_0001>
module attributes {stable_mosaic.version = 11 : i64} {
  func.func @_twinnet_kernel(%arg0: i32, %arg1: memref<32x16xf32, #tpu.memory_space<vmem>>, %arg2: memref<16x64xf32, #tpu.memory_space<vmem>>, %arg3: memref<1x64xf32, #tpu.memory_space<vmem>>, %arg4: memref<64x64xf32, #tpu.memory_space<vmem>>, %arg5: memref<1x64xf32, #tpu.memory_space<vmem>>, %arg6: memref<64x8xf32, #tpu.memory_space<vmem>>, %arg7: memref<1x8xf32, #tpu.memory_space<vmem>>, %arg8: memref<32x8xf32, #tpu.memory_space<vmem>>) attributes {dimension_semantics = [#tpu.dimension_semantics<parallel>], iteration_bounds = array<i64: 2>, scalar_prefetch = 0 : i64, scratch_operands = 0 : i64, tpu.core_type = #tpu.core_type<tc>, window_params = [{transform_indices = @transform_0, window_bounds = array<i64: 32, 16>}, {pipeline_mode = #tpu.pipeline_mode<synchronous>, transform_indices = @transform_1, window_bounds = array<i64: 16, 64>}, {pipeline_mode = #tpu.pipeline_mode<synchronous>, transform_indices = @transform_2, window_bounds = array<i64: 1, 64>}, {pipeline_mode = #tpu.pipeline_mode<synchronous>, transform_indices = @transform_3, window_bounds = array<i64: 64, 64>}, {pipeline_mode = #tpu.pipeline_mode<synchronous>, transform_indices = @transform_4, window_bounds = array<i64: 1, 64>}, {pipeline_mode = #tpu.pipeline_mode<synchronous>, transform_indices = @transform_5, window_bounds = array<i64: 64, 8>}, {pipeline_mode = #tpu.pipeline_mode<synchronous>, transform_indices = @transform_6, window_bounds = array<i64: 1, 8>}, {transform_indices = @transform_7, window_bounds = array<i64: 32, 8>}]} {
    %c0 = arith.constant 0 : index
    %c0_0 = arith.constant 0 : index
    %0 = vector.load %arg1[%c0, %c0_0] : memref<32x16xf32, #tpu.memory_space<vmem>>, vector<32x16xf32>
    %c0_1 = arith.constant 0 : index
    %c0_2 = arith.constant 0 : index
    %1 = vector.load %arg2[%c0_1, %c0_2] : memref<16x64xf32, #tpu.memory_space<vmem>>, vector<16x64xf32>
    %cst = arith.constant dense<0.000000e+00> : vector<32x64xf32>
    %2 = tpu.matmul %0, %1, %cst {dimension_numbers = #tpu.dot_dimension_numbers<[1], [0], [0], [1], [0, 0, 1, 1], [], []>} : vector<32x16xf32>, vector<16x64xf32>, vector<32x64xf32> -> vector<32x64xf32>
    %c0_3 = arith.constant 0 : index
    %c0_4 = arith.constant 0 : index
    %3 = vector.load %arg3[%c0_3, %c0_4] : memref<1x64xf32, #tpu.memory_space<vmem>>, vector<1x64xf32>
    %4 = vector.broadcast %3 : vector<1x64xf32> to vector<32x64xf32>
    %5 = arith.addf %2, %4 : vector<32x64xf32>
    %cst_5 = arith.constant 0.000000e+00 : f32
    %6 = vector.broadcast %cst_5 : f32 to vector<32x64xf32>
    %7 = arith.maximumf %5, %6 : vector<32x64xf32>
    %c0_6 = arith.constant 0 : index
    %c0_7 = arith.constant 0 : index
    %8 = vector.load %arg4[%c0_6, %c0_7] : memref<64x64xf32, #tpu.memory_space<vmem>>, vector<64x64xf32>
    %cst_8 = arith.constant dense<0.000000e+00> : vector<32x64xf32>
    %9 = tpu.matmul %7, %8, %cst_8 {dimension_numbers = #tpu.dot_dimension_numbers<[1], [0], [0], [1], [0, 0, 1, 1], [], []>} : vector<32x64xf32>, vector<64x64xf32>, vector<32x64xf32> -> vector<32x64xf32>
    %c0_9 = arith.constant 0 : index
    %c0_10 = arith.constant 0 : index
    %10 = vector.load %arg5[%c0_9, %c0_10] : memref<1x64xf32, #tpu.memory_space<vmem>>, vector<1x64xf32>
    %11 = vector.broadcast %10 : vector<1x64xf32> to vector<32x64xf32>
    %12 = arith.addf %9, %11 : vector<32x64xf32>
    %cst_11 = arith.constant 0.000000e+00 : f32
    %13 = vector.broadcast %cst_11 : f32 to vector<32x64xf32>
    %14 = arith.maximumf %12, %13 : vector<32x64xf32>
    %c0_12 = arith.constant 0 : index
    %c0_13 = arith.constant 0 : index
    %15 = vector.load %arg6[%c0_12, %c0_13] : memref<64x8xf32, #tpu.memory_space<vmem>>, vector<64x8xf32>
    %cst_14 = arith.constant dense<0.000000e+00> : vector<32x8xf32>
    %16 = tpu.matmul %14, %15, %cst_14 {dimension_numbers = #tpu.dot_dimension_numbers<[1], [0], [0], [1], [0, 0, 1, 1], [], []>} : vector<32x64xf32>, vector<64x8xf32>, vector<32x8xf32> -> vector<32x8xf32>
    %c0_15 = arith.constant 0 : index
    %c0_16 = arith.constant 0 : index
    %17 = vector.load %arg7[%c0_15, %c0_16] : memref<1x8xf32, #tpu.memory_space<vmem>>, vector<1x8xf32>
    %18 = vector.broadcast %17 : vector<1x8xf32> to vector<32x8xf32>
    %19 = arith.addf %16, %18 : vector<32x8xf32>
    %c0_17 = arith.constant 0 : index
    %c0_18 = arith.constant 0 : index
    %20 = vector.load %arg8[%c0_17, %c0_18] : memref<32x8xf32, #tpu.memory_space<vmem>>, vector<32x8xf32>
    tpu.vector_store %arg8[%c0_17, %c0_18], %19 {strides = array<i32>} : memref<32x8xf32, #tpu.memory_space<vmem>>, vector<32x8xf32>,
    return
  }
  func.func @transform_0(%arg0: i32) -> (i32, i32) {
    %c0_i32 = arith.constant 0 : i32
    %c0_i32_0 = arith.constant 0 : i32
    return %arg0, %c0_i32 : i32, i32
  }
  func.func @transform_1(%arg0: i32) -> (i32, i32) {
    %c0_i32 = arith.constant 0 : i32
    %c0_i32_0 = arith.constant 0 : i32
    %c0_i32_1 = arith.constant 0 : i32
    return %c0_i32, %c0_i32_0 : i32, i32
  }
  func.func @transform_2(%arg0: i32) -> (i32, i32) {
    %c0_i32 = arith.constant 0 : i32
    %c0_i32_0 = arith.constant 0 : i32
    %c0_i32_1 = arith.constant 0 : i32
    return %c0_i32, %c0_i32_0 : i32, i32
  }
  func.func @transform_3(%arg0: i32) -> (i32, i32) {
    %c0_i32 = arith.constant 0 : i32
    %c0_i32_0 = arith.constant 0 : i32
    %c0_i32_1 = arith.constant 0 : i32
    return %c0_i32, %c0_i32_0 : i32, i32
  }
  func.func @transform_4(%arg0: i32) -> (i32, i32) {
    %c0_i32 = arith.constant 0 : i32
    %c0_i32_0 = arith.constant 0 : i32
    %c0_i32_1 = arith.constant 0 : i32
    return %c0_i32, %c0_i32_0 : i32, i32
  }
  func.func @transform_5(%arg0: i32) -> (i32, i32) {
    %c0_i32 = arith.constant 0 : i32
    %c0_i32_0 = arith.constant 0 : i32
    %c0_i32_1 = arith.constant 0 : i32
    return %c0_i32, %c0_i32_0 : i32, i32
  }
  func.func @transform_6(%arg0: i32) -> (i32, i32) {
    %c0_i32 = arith.constant 0 : i32
    %c0_i32_0 = arith.constant 0 : i32
    %c0_i32_1 = arith.constant 0 : i32
    return %c0_i32, %c0_i32_0 : i32, i32
  }
  func.func @transform_7(%arg0: i32) -> (i32, i32) {
    %c0_i32 = arith.constant 0 : i32
    %c0_i32_0 = arith.constant 0 : i32
    return %arg0, %c0_i32 : i32, i32
  }
}

</mosaic_0001>

<bundles_post_ra>
// kernel: twinnet_forward.1
= control target key start
LH: loop header
LB: loop body
LE: loop exit
PB: predicated region body
PF: predicated region fallthrough
CT: control target
= control target key end

     0   :  { %s889_s24 = smov 0   ;;  %s984_s0 = inlined_call_operand.vmem [shape: f32[64,16], index: 0, kind: input, shape index: {}]   ;;  %s985_s1 = inlined_call_operand.vmem [shape: f32[16,64], index: 1, kind: input, shape index: {}]   ;;  %s986_s2 = inlined_call_operand.vmem [shape: f32[1,64], index: 2, kind: input, shape index: {}]   ;;  %s987_s3 = inlined_call_operand.vmem [shape: f32[64,64], index: 3, kind: input, shape index: {}]   ;;  %s988_s4 = inlined_call_operand.vmem [shape: f32[1,64], index: 4, kind: input, shape index: {}]   ;;  %s989_s5 = inlined_call_operand.vmem [shape: f32[64,8], index: 5, kind: input, shape index: {}]   ;;  %s990_s6 = inlined_call_operand.vmem [shape: f32[1,8], index: 6, kind: input, shape index: {}]   ;;  %s991_s7 = inlined_call_operand.vmem [shape: f32[64,8], index: 7, kind: output, shape index: {}]  }
   0x1 LB: > { %s687_s25 = sadd.s32 4294967295, %s847_s24   ;;  %p691_p0 = scmp.ge.s32.totalorder %s847_s24, 1  ;;  %s847_s24 = sphi %s889_s24, %s17_s24  }
   0x2   : > { %p238_p1 = scmp.lt.s32.totalorder %s847_s24, 3 }
   0x4   : > { %p239_p2 = pnand %p691_p0, %p238_p1 }
   0x5   : > { %v286_v0 = vld [vmem:[%s985_s1] sm:$0xff] (!%p239_p2)  ;;  %v287_v1 = vld [vmem:[%s985_s1 + $0x8] sm:$0xff] (!%p239_p2)  ;;  %s692_s30 = sshll.u32 (!%p239_p2), %s687_s25, 2  ;;  %v399_v5 = vld [vmem:[%s987_s3 + $0x10] sm:$0xff] (!%p239_p2)  ;;  %vm295_vm0 = vcmask (!%p239_p2), 130048   ;;  %vm412_vm1 = vcmask (!%p239_p2), 523264  }
   0x6   : > { %242 = sbr.rel (%p239_p2) target bundleno = 674 (0x2a2), region = 48  ;;  %v397_v2 = vld [vmem:[%s987_s3] sm:$0xff] (!%p239_p2)  ;;  %v797_v3 = vpack.c.bf16 (!%p239_p2), %v287_v1, %v286_v0  ;;  %p271_p3 = scmp.lt.s32.totalorder (!%p239_p2), %s692_s30, 7  ;;  %v398_v4 = vld [vmem:[%s987_s3 + $0x8] sm:$0xff] (!%p239_p2)  ;;  %v400_v6 = vld [vmem:[%s987_s3 + $0x18] sm:$0xff] (!%p239_p2)  ;;  %vm626_vm2 = vcmask (!%p239_p2), 64512  }
   0x7   : > { %v801_v7 = vpack.c.bf16 (!%p239_p2), %v398_v4, %v397_v2  ;;  %v805_v8 = vpack.c.bf16 (!%p239_p2), %v400_v6, %v399_v5  ;;  %v401_v9 = vld [vmem:[%s987_s3 + $0x20] sm:$0xff] (!%p239_p2)  ;;  %v402_v10 = vld [vmem:[%s987_s3 + $0x28] sm:$0xff] (!%p239_p2)  ;;  %v403_v16 = vld [vmem:[%s987_s3 + $0x30] sm:$0xff] (!%p239_p2) }
   0x8   : > { %798 = vmatprep.subr.bf16.mxu0 (!%p239_p2), %v797_v3  ;;  %v809_v11 = vpack.c.bf16 (!%p239_p2), %v402_v10, %v401_v9  ;;  %v404_v17 = vld [vmem:[%s987_s3 + $0x38] sm:$0xff] (!%p239_p2)  ;;  %v514_v19 = vld [vmem:[%s989_s5] sm:$0xff] (!%p239_p2)  ;;  %v515_v20 = vld [vmem:[%s989_s5 + $0x8] sm:$0xff] (!%p239_p2) }
   0x9   : > { %800 = vmatpush3.bf16.msra.mxu0 (!%p239_p2), %v797_v3  ;;  %802 = vmatprep.subr.bf16.mxu1 (!%p239_p2), %v801_v7  ;;  %v813_v18 = vpack.c.bf16 (!%p239_p2), %v404_v17, %v403_v16  ;;  %v516_v21 = vld [vmem:[%s989_s5 + $0x10] sm:$0xff] (!%p239_p2)  ;;  %v817_v22 = vpack.c.bf16 (!%p239_p2), %v515_v20, %v514_v19  ;;  %v517_v23 = vld [vmem:[%s989_s5 + $0x18] sm:$0xff] (!%p239_p2)  ;;  %v518_v25 = vld [vmem:[%s989_s5 + $0x20] sm:$0xff] (!%p239_p2) }
   0xa   : > { %804 = vmatpush3.bf16.msra.mxu1 (!%p239_p2), %v801_v7  ;;  %v821_v24 = vpack.c.bf16 (!%p239_p2), %v517_v23, %v516_v21  ;;  %v519_v26 = vld [vmem:[%s989_s5 + $0x28] sm:$0xff] (!%p239_p2)  ;;  %v696_v28 = vld [vmem:[%s986_s2] ss:$0 sm:$0xff] (!%p239_p2)  ;;  %v520_v41 = vld [vmem:[%s989_s5 + $0x30] sm:$0xff] (!%p239_p2) }
   0xb   : > { %806 = vmatprep.subr.bf16.mxu1 (!%p239_p2), %v805_v8  ;;  %818 = vmatprep.subr.bf16.mxu0 (!%p239_p2), %v817_v22  ;;  %v825_v27 = vpack.c.bf16 (!%p239_p2), %v519_v26, %v518_v25  ;;  %v521_v42 = vld [vmem:[%s989_s5 + $0x38] sm:$0xff] (!%p239_p2)  ;;  %v701_v44 = vld [vmem:[%s988_s4] ss:$0 sm:$0xff] (!%p239_p2) }
   0xc   : > { %v829_v43 = vpack.c.bf16 (!%p239_p2), %v521_v42, %v520_v41  ;;  %v706_v57 = vld [vmem:[%s990_s6] ss:$0 sm:$0xff] (!%p239_p2) }
   0xd   : > { %s993_s30 = smov (!%p271_p3, %s692_s30), 7 }
   0xe   : > { %s693_s20 = sshll.u32 %s993_s30, 3  ;;  %808 = vmatpush3.bf16.msra.mxu1 %v805_v8 }
   0xf   : > { %s274_s23 = scalar_lea.vmem %s984_s0, %s693_s20  ;;  %810 = vmatprep.subr.bf16.mxu1 %v809_v11  ;;  %s280_s11 = scalar_lea.vmem %s991_s7, %s693_s20 }
  0x10   : > { %v282_v12 = vld [vmem:[%s274_s23] sm:$0xff]  ;;  %v283_v13 = vld [vmem:[%s274_s23 + $0x8] sm:$0xff]  ;;  %v284_v14 = vld [vmem:[%s274_s23 + $0x10] sm:$0xff] }
  0x11   : > { %747 = vmatprep.mubr.msk.f32.mxu0 %vm295_vm0, %v282_v12  ;;  %v285_v15 = vld [vmem:[%s274_s23 + $0x18] sm:$0xff] }
  0x12   : > { %748 = vmatmul.mubr.msk.f32.vlgmr.msra.gmra.mrb[0].mxu0 %vm295_vm0, %v283_v13  ;;  %812 = vmatpush3.bf16.msra.mxu1 %v809_v11 }
  0x13   : > { %750 = vmatprep.mubr.msk.f32.mxu0 %vm295_vm0, %v284_v14  ;;  %814 = vmatprep.subr.bf16.mxu1 %v813_v18 }
  0x14   : > { %820 = vmatpush3.bf16.msra.mxu0 %v817_v22 }
  0x15   : > { %822 = vmatprep.subr.bf16.mxu0 %v821_v24 }
  0x16   : > { %751 = vmatmul.mubr.msk.f32.gmra.mrb[2].mxu0 %vm295_vm0, %v285_v15  ;;  %816 = vmatpush3.bf16.msra.mxu1 %v813_v18 }
  0x18   : > { %824 = vmatpush3.bf16.msra.mxu0 %v821_v24 }
  0x19   : > { %826 = vmatprep.subr.bf16.mxu0 %v825_v27 }
  0x1c   : > { %828 = vmatpush3.bf16.msra.mxu0 %v825_v27 }
  0x1d   : > { %830 = vmatprep.subr.bf16.mxu0 %v829_v43 }
  0x20   : > { %832 = vmatpush3.bf16.msra.mxu0 %v829_v43 }
  0xe5   : > { %v749_v29 = vpop.f32.mrb[0].mxu0 }
  0xe6   : > { %v380_v30 = vadd.f32 %v749_v29, %v696_v28  ;;  %v374_v31 = vpop.f32.mrb[1].mxu0 }
  0xe7   : > { %v375_v32 = vadd.f32 %v696_v28, %v374_v31 }
  0xe8   : > { %v394_v35 = vmax.f32 %v380_v30, 0.0 }
  0xe9   : > { %v393_v33 = vmax.f32 %v375_v32, 0.0  ;;  %v752_v34 = vpop.f32.mrb[2].mxu0 }
  0xea   : > { %v390_v36 = vadd.f32 %v752_v34, %v696_v28  ;;  %v384_v37 = vpop.f32.mrb[3].mxu0 }
  0xeb   : > { %v385_v38 = vadd.f32 %v696_v28, %v384_v37  ;;  %769 = vmatprep.mubr.msk.f32.mxu1 %vm412_vm1, %v393_v33 }
  0xec   : > { %770 = vmatmul.mubr.msk.f32.vlgmr.msra.gmra.mrb[0].mxu1 %vm412_vm1, %v394_v35  ;;  %v396_v40 = vmax.f32 %v390_v36, 0.0 }
  0xed   : > { %v395_v39 = vmax.f32 %v385_v38, 0.0 }
  0xef   : > { %772 = vmatprep.mubr.msk.f32.mxu1 %vm412_vm1, %v395_v39 }
  0xf0   : > { %773 = vmatmul.mubr.msk.f32.gmra.mrb[2].mxu1 %vm412_vm1, %v396_v40 }
 0x1bf   : > { %v771_v45 = vpop.f32.mrb[0].mxu1 }
 0x1c0   : > { %v497_v46 = vadd.f32 %v771_v45, %v701_v44  ;;  %v491_v47 = vpop.f32.mrb[1].mxu1 }
 0x1c1   : > { %v492_v48 = vadd.f32 %v701_v44, %v491_v47 }
 0x1c2   : > { %v511_v51 = vmax.f32 %v497_v46, 0.0 }
 0x1c3   : > { %v510_v49 = vmax.f32 %v492_v48, 0.0  ;;  %v774_v50 = vpop.f32.mrb[2].mxu1 }
 0x1c4   : > { %v507_v52 = vadd.f32 %v774_v50, %v701_v44  ;;  %v501_v53 = vpop.f32.mrb[3].mxu1 }
 0x1c5   : > { %v502_v54 = vadd.f32 %v701_v44, %v501_v53  ;;  %791 = vmatprep.mubr.msk.f32.mxu0 %vm412_vm1, %v510_v49 }
 0x1c6   : > { %792 = vmatmul.mubr.msk.f32.vlgmr.msra.gmra.mrb[4].mxu0 %vm412_vm1, %v511_v51  ;;  %v513_v56 = vmax.f32 %v507_v52, 0.0 }
 0x1c7   : > { %v512_v55 = vmax.f32 %v502_v54, 0.0 }
 0x1c9   : > { %794 = vmatprep.mubr.msk.f32.mxu0 %vm412_vm1, %v512_v55 }
 0x1ca   : > { %795 = vmatmul.mubr.msk.f32.gmra.mrb[6].mxu0 %vm412_vm1, %v513_v56 }
 0x299   : > { %v793_v58 = vpop.f32.mrb[4].mxu0 }
 0x29a   : > { %v607_v59 = vpop.f32.mrb[5].mxu0  ;;  %v613_v61 = vadd.f32 %v793_v58, %v706_v57 }
 0x29b   : > { %v608_v60 = vadd.f32 %v706_v57, %v607_v59 }
 0x29c   : > { %628 = vst.msk [vmem:[%s280_s11 + $0x8] sm:$0xff] %vm626_vm2, %v613_v61 }
 0x29d   : > { %627 = vst.msk [vmem:[%s280_s11] sm:$0xff] %vm626_vm2, %v608_v60  ;;  %v796_v62 = vpop.f32.mrb[6].mxu0 }
 0x29e   : > { %v617_v63 = vpop.f32.mrb[7].mxu0  ;;  %v623_v1 = vadd.f32 %v796_v62, %v706_v57 }
 0x29f   : > { %v618_v0 = vadd.f32 %v706_v57, %v617_v63 }
 0x2a0   : > { %630 = vst.msk [vmem:[%s280_s11 + $0x18] sm:$0xff] %vm626_vm2, %v623_v1 }
 0x2a1   : > { %629 = vst.msk [vmem:[%s280_s11 + $0x10] sm:$0xff] %vm626_vm2, %v618_v0 }
 0x2a2 PF: > { %s17_s24 = sadd.s32 1, %s847_s24  }
 0x2a3   : > { %p14_p4 = scmp.ge.s32.totalorder %s17_s24, 4  }
 0x2a5   :  { %16 = sbr.rel (!%p14_p4) target bundleno = 1 (0x1), region = 78 }

</bundles_post_ra>
